<compile_context>
chip_gen: v7x
topology: tpu7x:2x2x1
jax: 0.10.0
libtpu: 0.0.40
codegen_flags: <defaults>
</compile_context>

<pallas_src>
import jax
import jax.numpy as jnp
import numpy as np
from jax.experimental import pallas as pl

# ---- module hyper-parameters (MultiHeadAttention_SimilarKV) -----------------
N_HEADS = 2
KV_IN = 4            # kv_in_channels (parent q_in_channels == v_in_channels)
Q_IN = 6             # q_in_channels  (parent k_in_channels)
B = 2
H = W = 8
S = H * W                       # 64 spatial positions
CQN = KV_IN * N_HEADS           # conv_query out channels = 8
CVN = KV_IN * N_HEADS           # conv_key / conv_value out channels = 8
G = S // CQN                    # lane-group size of the permute+view decomposition
BN_EPS = 1e-4
LEAKY_SLOPE = 0.01              # PyTorch LeakyReLU default
SCALE = float(S) ** 0.5         # query.size(-1) ** 0.5 == 8.0 (folded into Wq/bq)

# The permute(0,2,1)+view trick requires these (true for this module).
assert CQN == CVN and S % CQN == 0


def _leaky(x):
    return jnp.where(x >= 0, x, LEAKY_SLOPE * x)


# ---- constant selector matrices implementing permute(0,2,1)+view ------------
# Mapping (per batch b):  x[a, CQN*r + c] = attn[c, a*G + r]
# Realised as:
#   gall = LBIG . attn^T            (one gather matmul, shape (S, CQN))
#   x_all[:, b*S : (b+1)*S] = sum_r gall[r*CVN:(r+1)*CVN, :] @ R_{b,r}
# where R_{b,r} scatters directly into the batch-stacked (CVN, B*S) slab.
def _selectors():
    lbig = np.zeros((S, S), np.float32)
    for r in range(G):
        for a in range(CVN):
            lbig[r * CVN + a, a * G + r] = 1.0       # gathers attn column a*G + r
    rsel = np.zeros((B, G, CQN, B * S), np.float32)
    for b in range(B):
        for r in range(G):
            for c in range(CQN):
                rsel[b, r, c, b * S + CQN * r + c] = 1.0   # scatter into stacked x
    return jnp.asarray(lbig), jnp.asarray(rsel)


LSEL, RSEL = _selectors()


# ---- single fused kernel -----------------------------------------------------
def fused_kernel(kv_ref, q_ref, wqv_ref, bqv_ref, wk_ref, bk_ref,
                 lsel_ref, rsel_ref, gb_ref, w1_ref, b1_ref, w2_ref, b2_ref,
                 o_ref):
    lsel = lsel_ref[...]                        # (S, S), hoisted out of the loop
    x_all = jnp.zeros((CVN, B * S), jnp.float32)

    for b in range(B):                          # static unroll, B = 2
        kv_b = kv_ref[b]                        # (KV_IN, S)
        q_b = q_ref[b]                          # (Q_IN,  S)

        # packed 1x1 convs on the shared kv input:
        # rows [0:CQN]        -> conv_query (pre-scaled by 1/sqrt(S))
        # rows [CQN:CQN+CVN]  -> conv_value
        qv = jnp.dot(wqv_ref[...], kv_b,
                     preferred_element_type=jnp.float32) + bqv_ref[...]
        query = qv[0:CQN]                       # (CQN, S), already scaled
        value = qv[CQN:CQN + CVN]               # (CVN, S)
        key = jnp.dot(wk_ref[...], q_b,
                      preferred_element_type=jnp.float32) + bk_ref[...]

        # scaled dot-product attention: logits[c, d] = sum_s query[c,s] key[d,s]
        logits = jax.lax.dot_general(query, key, (((1,), (1,)), ((), ())),
                                     preferred_element_type=jnp.float32)
        m = jnp.max(logits, axis=-1, keepdims=True)
        e = jnp.exp(logits - m)
        p = e * pl.reciprocal(jnp.sum(e, axis=-1, keepdims=True), approx=True)
        attn = jnp.dot(p, value, preferred_element_type=jnp.float32)   # (CQN, S)

        # permute(0,2,1) + view via MXU selector matmuls:
        #   gall[r*CVN + a, c] = attn[c, a*G + r]     (one gather matmul)
        gall = jax.lax.dot_general(lsel, attn, (((1,), (1,)), ((), ())),
                                   preferred_element_type=jnp.float32)  # (S, CQN)
        for r in range(G):
            g_r = gall[r * CVN:(r + 1) * CVN, :]                        # (CVN, CQN)
            x_all = x_all + jnp.dot(g_r, rsel_ref[b, r],
                                    preferred_element_type=jnp.float32)  # (CVN, B*S)

    # ---- BatchNorm2d statistics (training mode, biased variance) ------------
    # x_all is batch-stacked along lanes -> one full-width reduction.
    n_tot = float(B * S)
    mean = jnp.sum(x_all, axis=-1, keepdims=True) / n_tot                # (CVN, 1)
    var = jnp.sum((x_all - mean) ** 2, axis=-1, keepdims=True) / n_tot   # (CVN, 1)
    a = gb_ref[:, 0:1] * jax.lax.rsqrt(var + BN_EPS)     # gamma * rsqrt(var+eps)
    c = gb_ref[:, 1:2] - a * mean                        # beta - a*mean

    # ---- conv_out tail: single 128-lane-wide matmuls -------------------------
    h = _leaky(a * x_all + c)
    h = _leaky(jnp.dot(w1_ref[...], h,
                       preferred_element_type=jnp.float32) + b1_ref[...])
    o_ref[...] = jnp.dot(w2_ref[...], h,
                         preferred_element_type=jnp.float32) + b2_ref[...]


# ---- wrapper -----------------------------------------------------------------
def pack_params(p):
    """One-time host-side packing (outside the hot path)."""
    wqv = jnp.concatenate([p["wq"] / SCALE, p["wv"]], axis=0)   # (CQN+CVN, KV_IN)
    bqv = jnp.concatenate([p["bq"] / SCALE, p["bv"]], axis=0)   # (CQN+CVN, 1)
    gb = jnp.concatenate([p["gamma"], p["beta"]], axis=1)       # (CVN, 2)
    return {"wqv": wqv, "bqv": bqv, "wk": p["wk"], "bk": p["bk"], "gb": gb,
            "w1": p["w1"], "b1": p["b1"], "w2": p["w2"], "b2": p["b2"]}


@jax.jit
def multi_head_attention_similar_kv(kv, q, packed):
    Bq = kv.shape[0]
    assert Bq == B, "kernel is specialised for batch size B"
    kv_f = kv.reshape(Bq, KV_IN, S)
    q_f = q.reshape(Bq, Q_IN, S)
    out = pl.pallas_call(
        fused_kernel,
        out_shape=jax.ShapeDtypeStruct((KV_IN, Bq * S), jnp.float32),
    )(kv_f, q_f, packed["wqv"], packed["bqv"], packed["wk"], packed["bk"],
      LSEL, RSEL, packed["gb"], packed["w1"], packed["b1"],
      packed["w2"], packed["b2"])
    # columns are [batch0 | batch1]; un-stack to (B, KV_IN, H, W)
    return out.reshape(KV_IN, Bq, S).transpose(1, 0, 2).reshape(Bq, KV_IN, H, W)


# ---- pure-JAX reference (mirrors the PyTorch module) --------------------------
def reference(kv, q, p):
    Bq = kv.shape[0]

    def conv1x1(x, w, b):
        xf = x.reshape(x.shape[0], x.shape[1], -1)
        return jnp.einsum("oc,bcs->bos", w, xf) + b[None]

    query = conv1x1(kv, p["wq"], p["bq"])
    key = conv1x1(q, p["wk"], p["bk"])
    value = conv1x1(kv, p["wv"], p["bv"])
    temp = jnp.einsum("bcs,bds->bcd", query, key)
    soft = jax.nn.softmax(temp / (query.shape[-1] ** 0.5), axis=-1)
    out = jnp.einsum("bcd,bds->bcs", soft, value)
    xf = out.transpose(0, 2, 1).reshape(Bq, CVN, S)        # permute + view
    mean = xf.mean(axis=(0, 2), keepdims=True)
    var = jnp.var(xf, axis=(0, 2), keepdims=True)          # biased (training BN)
    xn = (xf - mean) / jnp.sqrt(var + BN_EPS) * p["gamma"][None] + p["beta"][None]
    h = jnp.where(xn >= 0, xn, LEAKY_SLOPE * xn)
    h = jnp.einsum("oc,bcs->bos", p["w1"], h) + p["b1"][None]
    h = jnp.where(h >= 0, h, LEAKY_SLOPE * h)
    y = jnp.einsum("oc,bcs->bos", p["w2"], h) + p["b2"][None]
    return y.reshape(Bq, KV_IN, H, W)


def init_params(key):
    ks = jax.random.split(key, 10)
    f = jnp.float32
    return {
        "wq": jax.random.normal(ks[0], (CQN, KV_IN), f) * 0.2,
        "bq": jax.random.normal(ks[1], (CQN, 1), f) * 0.1,
        "wk": jax.random.normal(ks[2], (CVN, Q_IN), f) * 0.2,
        "bk": jax.random.normal(ks[3], (CVN, 1), f) * 0.1,
        "wv": jax.random.normal(ks[4], (CVN, KV_IN), f) * 0.2,
        "bv": jax.random.normal(ks[5], (CVN, 1), f) * 0.1,
        "gamma": jnp.ones((CVN, 1), f),     # BatchNorm2d default init
        "beta": jnp.zeros((CVN, 1), f),
        "w1": jax.random.normal(ks[6], (CVN, CVN), f) * 0.2,
        "b1": jax.random.normal(ks[7], (CVN, 1), f) * 0.1,
        "w2": jax.random.normal(ks[8], (KV_IN, CVN), f) * 0.2,
        "b2": jax.random.normal(ks[9], (KV_IN, 1), f) * 0.1,
    }


if __name__ == "__main__":
    root = jax.random.PRNGKey(0)
    k_kv, k_q, k_p = jax.random.split(root, 3)
    kv = jax.random.normal(k_kv, (B, KV_IN, H, W), jnp.float32)
    q = jax.random.normal(k_q, (B, Q_IN, H, W), jnp.float32)
    params = init_params(k_p)
    packed = pack_params(params)

    out = jax.block_until_ready(multi_head_attention_similar_kv(kv, q, packed))
    ref = jax.block_until_ready(reference(kv, q, params))

    assert out.shape == (B, KV_IN, H, W), out.shape
    # tolerance accounts for the EUP approximate-reciprocal softmax denominator
    if not jnp.allclose(out, ref, rtol=1e-2, atol=1e-2):
        err = float(jnp.max(jnp.abs(out - ref)))
        raise AssertionError(f"Pallas kernel mismatch vs JAX reference (max abs err {err})")
    print("KERNEL_OK")
</pallas_src>

<mosaic_0001>
module attributes {stable_mosaic.version = 11 : i64} {
  func.func @fused_kernel(%arg0: memref<2x4x64xf32, #tpu.memory_space<vmem>>, %arg1: memref<2x6x64xf32, #tpu.memory_space<vmem>>, %arg2: memref<16x4xf32, #tpu.memory_space<vmem>>, %arg3: memref<16x1xf32, #tpu.memory_space<vmem>>, %arg4: memref<8x6xf32, #tpu.memory_space<vmem>>, %arg5: memref<8x1xf32, #tpu.memory_space<vmem>>, %arg6: memref<64x64xf32, #tpu.memory_space<vmem>>, %arg7: memref<2x8x8x128xf32, #tpu.memory_space<vmem>>, %arg8: memref<8x2xf32, #tpu.memory_space<vmem>>, %arg9: memref<8x8xf32, #tpu.memory_space<vmem>>, %arg10: memref<8x1xf32, #tpu.memory_space<vmem>>, %arg11: memref<4x8xf32, #tpu.memory_space<vmem>>, %arg12: memref<4x1xf32, #tpu.memory_space<vmem>>, %arg13: memref<4x128xf32, #tpu.memory_space<vmem>>) attributes {dimension_semantics = [], scalar_prefetch = 0 : i64, scratch_operands = 0 : i64, tpu.core_type = #tpu.core_type<tc>} {
    %c0 = arith.constant 0 : index
    %c0_0 = arith.constant 0 : index
    %0 = vector.load %arg6[%c0, %c0_0] : memref<64x64xf32, #tpu.memory_space<vmem>>, vector<64x64xf32>
    %cst = arith.constant 0.000000e+00 : f32
    %1 = vector.broadcast %cst : f32 to vector<8x128xf32>
    %c0_1 = arith.constant 0 : index
    %c0_2 = arith.constant 0 : index
    %c0_3 = arith.constant 0 : index
    %2 = vector.load %arg0[%c0_1, %c0_2, %c0_3] : memref<2x4x64xf32, #tpu.memory_space<vmem>>, vector<1x4x64xf32>
    %3 = vector.shape_cast %2 : vector<1x4x64xf32> to vector<4x64xf32>
    %c0_4 = arith.constant 0 : index
    %c0_5 = arith.constant 0 : index
    %c0_6 = arith.constant 0 : index
    %4 = vector.load %arg1[%c0_4, %c0_5, %c0_6] : memref<2x6x64xf32, #tpu.memory_space<vmem>>, vector<1x6x64xf32>
    %5 = vector.shape_cast %4 : vector<1x6x64xf32> to vector<6x64xf32>
    %c0_7 = arith.constant 0 : index
    %c0_8 = arith.constant 0 : index
    %6 = vector.load %arg2[%c0_7, %c0_8] : memref<16x4xf32, #tpu.memory_space<vmem>>, vector<16x4xf32>
    %cst_9 = arith.constant dense<0.000000e+00> : vector<16x64xf32>
    %7 = tpu.matmul %6, %3, %cst_9 {dimension_numbers = #tpu.dot_dimension_numbers<[1], [0], [0], [1], [0, 0, 1, 1], [], []>} : vector<16x4xf32>, vector<4x64xf32>, vector<16x64xf32> -> vector<16x64xf32>
    %c0_10 = arith.constant 0 : index
    %c0_11 = arith.constant 0 : index
    %8 = vector.load %arg3[%c0_10, %c0_11] : memref<16x1xf32, #tpu.memory_space<vmem>>, vector<16x1xf32>
    %9 = vector.broadcast %8 : vector<16x1xf32> to vector<16x64xf32>
    %10 = arith.addf %7, %9 : vector<16x64xf32>
    %11 = vector.extract_strided_slice %10 {offsets = [0, 0], sizes = [8, 64], strides = [1, 1]} : vector<16x64xf32> to vector<8x64xf32>
    %12 = vector.extract_strided_slice %10 {offsets = [8, 0], sizes = [8, 64], strides = [1, 1]} : vector<16x64xf32> to vector<8x64xf32>
    %c0_12 = arith.constant 0 : index
    %c0_13 = arith.constant 0 : index
    %13 = vector.load %arg4[%c0_12, %c0_13] : memref<8x6xf32, #tpu.memory_space<vmem>>, vector<8x6xf32>
    %cst_14 = arith.constant dense<0.000000e+00> : vector<8x64xf32>
    %14 = tpu.matmul %13, %5, %cst_14 {dimension_numbers = #tpu.dot_dimension_numbers<[1], [0], [0], [1], [0, 0, 1, 1], [], []>} : vector<8x6xf32>, vector<6x64xf32>, vector<8x64xf32> -> vector<8x64xf32>
    %c0_15 = arith.constant 0 : index
    %c0_16 = arith.constant 0 : index
    %15 = vector.load %arg5[%c0_15, %c0_16] : memref<8x1xf32, #tpu.memory_space<vmem>>, vector<8x1xf32>
    %16 = vector.broadcast %15 : vector<8x1xf32> to vector<8x64xf32>
    %17 = arith.addf %14, %16 : vector<8x64xf32>
    %cst_17 = arith.constant dense<0.000000e+00> : vector<8x8xf32>
    %18 = tpu.matmul %11, %17, %cst_17 {dimension_numbers = #tpu.dot_dimension_numbers<[1], [1], [0], [0], [0, 0, 1, 0], [], []>} : vector<8x64xf32>, vector<8x64xf32>, vector<8x8xf32> -> vector<8x8xf32>
    %cst_18 = arith.constant dense<0xFF800000> : vector<8xf32>
    %19 = vector.multi_reduction <maximumf>, %18, %cst_18 [1] : vector<8x8xf32> to vector<8xf32>
    %20 = vector.shape_cast %19 : vector<8xf32> to vector<8x1xf32>
    %21 = vector.broadcast %20 : vector<8x1xf32> to vector<8x8xf32>
    %22 = arith.subf %18, %21 : vector<8x8xf32>
    %23 = math.exp %22 : vector<8x8xf32>
    %cst_19 = arith.constant dense<0.000000e+00> : vector<8xf32>
    %24 = vector.multi_reduction <add>, %23, %cst_19 [1] : vector<8x8xf32> to vector<8xf32>
    %25 = vector.shape_cast %24 : vector<8xf32> to vector<8x1xf32>
    %26 = tpu.reciprocal %25 {approx = true} : vector<8x1xf32> -> vector<8x1xf32>
    %27 = vector.broadcast %26 : vector<8x1xf32> to vector<8x8xf32>
    %28 = arith.mulf %23, %27 : vector<8x8xf32>
    %cst_20 = arith.constant dense<0.000000e+00> : vector<8x64xf32>
    %29 = tpu.matmul %28, %12, %cst_20 {dimension_numbers = #tpu.dot_dimension_numbers<[1], [0], [0], [1], [0, 0, 1, 1], [], []>} : vector<8x8xf32>, vector<8x64xf32>, vector<8x64xf32> -> vector<8x64xf32>
    %cst_21 = arith.constant dense<0.000000e+00> : vector<64x8xf32>
    %30 = tpu.matmul %0, %29, %cst_21 {dimension_numbers = #tpu.dot_dimension_numbers<[1], [1], [0], [0], [0, 0, 1, 0], [], []>} : vector<64x64xf32>, vector<8x64xf32>, vector<64x8xf32> -> vector<64x8xf32>
    %31 = vector.extract_strided_slice %30 {offsets = [0, 0], sizes = [8, 8], strides = [1, 1]} : vector<64x8xf32> to vector<8x8xf32>
    %c0_22 = arith.constant 0 : index
    %c0_23 = arith.constant 0 : index
    %c0_24 = arith.constant 0 : index
    %c0_25 = arith.constant 0 : index
    %32 = vector.load %arg7[%c0_22, %c0_23, %c0_24, %c0_25] : memref<2x8x8x128xf32, #tpu.memory_space<vmem>>, vector<1x1x8x128xf32>
    %33 = vector.shape_cast %32 : vector<1x1x8x128xf32> to vector<8x128xf32>
    %cst_26 = arith.constant dense<0.000000e+00> : vector<8x128xf32>
    %34 = tpu.matmul %31, %33, %cst_26 {dimension_numbers = #tpu.dot_dimension_numbers<[1], [0], [0], [1], [0, 0, 1, 1], [], []>} : vector<8x8xf32>, vector<8x128xf32>, vector<8x128xf32> -> vector<8x128xf32>
    %35 = arith.addf %1, %34 : vector<8x128xf32>
    %36 = vector.extract_strided_slice %30 {offsets = [8, 0], sizes = [8, 8], strides = [1, 1]} : vector<64x8xf32> to vector<8x8xf32>
    %c0_27 = arith.constant 0 : index
    %c1 = arith.constant 1 : index
    %c0_28 = arith.constant 0 : index
    %c0_29 = arith.constant 0 : index
    %37 = vector.load %arg7[%c0_27, %c1, %c0_28, %c0_29] : memref<2x8x8x128xf32, #tpu.memory_space<vmem>>, vector<1x1x8x128xf32>
    %38 = vector.shape_cast %37 : vector<1x1x8x128xf32> to vector<8x128xf32>
    %cst_30 = arith.constant dense<0.000000e+00> : vector<8x128xf32>
    %39 = tpu.matmul %36, %38, %cst_30 {dimension_numbers = #tpu.dot_dimension_numbers<[1], [0], [0], [1], [0, 0, 1, 1], [], []>} : vector<8x8xf32>, vector<8x128xf32>, vector<8x128xf32> -> vector<8x128xf32>
    %40 = arith.addf %35, %39 : vector<8x128xf32>
    %41 = vector.extract_strided_slice %30 {offsets = [16, 0], sizes = [8, 8], strides = [1, 1]} : vector<64x8xf32> to vector<8x8xf32>
    %c0_31 = arith.constant 0 : index
    %c2 = arith.constant 2 : index
    %c0_32 = arith.constant 0 : index
    %c0_33 = arith.constant 0 : index
    %42 = vector.load %arg7[%c0_31, %c2, %c0_32, %c0_33] : memref<2x8x8x128xf32, #tpu.memory_space<vmem>>, vector<1x1x8x128xf32>
    %43 = vector.shape_cast %42 : vector<1x1x8x128xf32> to vector<8x128xf32>
    %cst_34 = arith.constant dense<0.000000e+00> : vector<8x128xf32>
    %44 = tpu.matmul %41, %43, %cst_34 {dimension_numbers = #tpu.dot_dimension_numbers<[1], [0], [0], [1], [0, 0, 1, 1], [], []>} : vector<8x8xf32>, vector<8x128xf32>, vector<8x128xf32> -> vector<8x128xf32>
    %45 = arith.addf %40, %44 : vector<8x128xf32>
    %46 = vector.extract_strided_slice %30 {offsets = [24, 0], sizes = [8, 8], strides = [1, 1]} : vector<64x8xf32> to vector<8x8xf32>
    %c0_35 = arith.constant 0 : index
    %c3 = arith.constant 3 : index
    %c0_36 = arith.constant 0 : index
    %c0_37 = arith.constant 0 : index
    %47 = vector.load %arg7[%c0_35, %c3, %c0_36, %c0_37] : memref<2x8x8x128xf32, #tpu.memory_space<vmem>>, vector<1x1x8x128xf32>
    %48 = vector.shape_cast %47 : vector<1x1x8x128xf32> to vector<8x128xf32>
    %cst_38 = arith.constant dense<0.000000e+00> : vector<8x128xf32>
    %49 = tpu.matmul %46, %48, %cst_38 {dimension_numbers = #tpu.dot_dimension_numbers<[1], [0], [0], [1], [0, 0, 1, 1], [], []>} : vector<8x8xf32>, vector<8x128xf32>, vector<8x128xf32> -> vector<8x128xf32>
    %50 = arith.addf %45, %49 : vector<8x128xf32>
    %51 = vector.extract_strided_slice %30 {offsets = [32, 0], sizes = [8, 8], strides = [1, 1]} : vector<64x8xf32> to vector<8x8xf32>
    %c0_39 = arith.constant 0 : index
    %c4 = arith.constant 4 : index
    %c0_40 = arith.constant 0 : index
    %c0_41 = arith.constant 0 : index
    %52 = vector.load %arg7[%c0_39, %c4, %c0_40, %c0_41] : memref<2x8x8x128xf32, #tpu.memory_space<vmem>>, vector<1x1x8x128xf32>
    %53 = vector.shape_cast %52 : vector<1x1x8x128xf32> to vector<8x128xf32>
    %cst_42 = arith.constant dense<0.000000e+00> : vector<8x128xf32>
    %54 = tpu.matmul %51, %53, %cst_42 {dimension_numbers = #tpu.dot_dimension_numbers<[1], [0], [0], [1], [0, 0, 1, 1], [], []>} : vector<8x8xf32>, vector<8x128xf32>, vector<8x128xf32> -> vector<8x128xf32>
    %55 = arith.addf %50, %54 : vector<8x128xf32>
    %56 = vector.extract_strided_slice %30 {offsets = [40, 0], sizes = [8, 8], strides = [1, 1]} : vector<64x8xf32> to vector<8x8xf32>
    %c0_43 = arith.constant 0 : index
    %c5 = arith.constant 5 : index
    %c0_44 = arith.constant 0 : index
    %c0_45 = arith.constant 0 : index
    %57 = vector.load %arg7[%c0_43, %c5, %c0_44, %c0_45] : memref<2x8x8x128xf32, #tpu.memory_space<vmem>>, vector<1x1x8x128xf32>
    %58 = vector.shape_cast %57 : vector<1x1x8x128xf32> to vector<8x128xf32>
    %cst_46 = arith.constant dense<0.000000e+00> : vector<8x128xf32>
    %59 = tpu.matmul %56, %58, %cst_46 {dimension_numbers = #tpu.dot_dimension_numbers<[1], [0], [0], [1], [0, 0, 1, 1], [], []>} : vector<8x8xf32>, vector<8x128xf32>, vector<8x128xf32> -> vector<8x128xf32>
    %60 = arith.addf %55, %59 : vector<8x128xf32>
    %61 = vector.extract_strided_slice %30 {offsets = [48, 0], sizes = [8, 8], strides = [1, 1]} : vector<64x8xf32> to vector<8x8xf32>
    %c0_47 = arith.constant 0 : index
    %c6 = arith.constant 6 : index
    %c0_48 = arith.constant 0 : index
    %c0_49 = arith.constant 0 : index
    %62 = vector.load %arg7[%c0_47, %c6, %c0_48, %c0_49] : memref<2x8x8x128xf32, #tpu.memory_space<vmem>>, vector<1x1x8x128xf32>
    %63 = vector.shape_cast %62 : vector<1x1x8x128xf32> to vector<8x128xf32>
    %cst_50 = arith.constant dense<0.000000e+00> : vector<8x128xf32>
    %64 = tpu.matmul %61, %63, %cst_50 {dimension_numbers = #tpu.dot_dimension_numbers<[1], [0], [0], [1], [0, 0, 1, 1], [], []>} : vector<8x8xf32>, vector<8x128xf32>, vector<8x128xf32> -> vector<8x128xf32>
    %65 = arith.addf %60, %64 : vector<8x128xf32>
    %66 = vector.extract_strided_slice %30 {offsets = [56, 0], sizes = [8, 8], strides = [1, 1]} : vector<64x8xf32> to vector<8x8xf32>
    %c0_51 = arith.constant 0 : index
    %c7 = arith.constant 7 : index
    %c0_52 = arith.constant 0 : index
    %c0_53 = arith.constant 0 : index
    %67 = vector.load %arg7[%c0_51, %c7, %c0_52, %c0_53] : memref<2x8x8x128xf32, #tpu.memory_space<vmem>>, vector<1x1x8x128xf32>
    %68 = vector.shape_cast %67 : vector<1x1x8x128xf32> to vector<8x128xf32>
    %cst_54 = arith.constant dense<0.000000e+00> : vector<8x128xf32>
    %69 = tpu.matmul %66, %68, %cst_54 {dimension_numbers = #tpu.dot_dimension_numbers<[1], [0], [0], [1], [0, 0, 1, 1], [], []>} : vector<8x8xf32>, vector<8x128xf32>, vector<8x128xf32> -> vector<8x128xf32>
    %70 = arith.addf %65, %69 : vector<8x128xf32>
    %c1_55 = arith.constant 1 : index
    %c0_56 = arith.constant 0 : index
    %c0_57 = arith.constant 0 : index
    %71 = vector.load %arg0[%c1_55, %c0_56, %c0_57] : memref<2x4x64xf32, #tpu.memory_space<vmem>>, vector<1x4x64xf32>
    %72 = vector.shape_cast %71 : vector<1x4x64xf32> to vector<4x64xf32>
    %c1_58 = arith.constant 1 : index
    %c0_59 = arith.constant 0 : index
    %c0_60 = arith.constant 0 : index
    %73 = vector.load %arg1[%c1_58, %c0_59, %c0_60] : memref<2x6x64xf32, #tpu.memory_space<vmem>>, vector<1x6x64xf32>
    %74 = vector.shape_cast %73 : vector<1x6x64xf32> to vector<6x64xf32>
    %c0_61 = arith.constant 0 : index
    %c0_62 = arith.constant 0 : index
    %75 = vector.load %arg2[%c0_61, %c0_62] : memref<16x4xf32, #tpu.memory_space<vmem>>, vector<16x4xf32>
    %cst_63 = arith.constant dense<0.000000e+00> : vector<16x64xf32>
    %76 = tpu.matmul %75, %72, %cst_63 {dimension_numbers = #tpu.dot_dimension_numbers<[1], [0], [0], [1], [0, 0, 1, 1], [], []>} : vector<16x4xf32>, vector<4x64xf32>, vector<16x64xf32> -> vector<16x64xf32>
    %c0_64 = arith.constant 0 : index
    %c0_65 = arith.constant 0 : index
    %77 = vector.load %arg3[%c0_64, %c0_65] : memref<16x1xf32, #tpu.memory_space<vmem>>, vector<16x1xf32>
    %78 = vector.broadcast %77 : vector<16x1xf32> to vector<16x64xf32>
    %79 = arith.addf %76, %78 : vector<16x64xf32>
    %80 = vector.extract_strided_slice %79 {offsets = [0, 0], sizes = [8, 64], strides = [1, 1]} : vector<16x64xf32> to vector<8x64xf32>
    %81 = vector.extract_strided_slice %79 {offsets = [8, 0], sizes = [8, 64], strides = [1, 1]} : vector<16x64xf32> to vector<8x64xf32>
    %c0_66 = arith.constant 0 : index
    %c0_67 = arith.constant 0 : index
    %82 = vector.load %arg4[%c0_66, %c0_67] : memref<8x6xf32, #tpu.memory_space<vmem>>, vector<8x6xf32>
    %cst_68 = arith.constant dense<0.000000e+00> : vector<8x64xf32>
    %83 = tpu.matmul %82, %74, %cst_68 {dimension_numbers = #tpu.dot_dimension_numbers<[1], [0], [0], [1], [0, 0, 1, 1], [], []>} : vector<8x6xf32>, vector<6x64xf32>, vector<8x64xf32> -> vector<8x64xf32>
    %c0_69 = arith.constant 0 : index
    %c0_70 = arith.constant 0 : index
    %84 = vector.load %arg5[%c0_69, %c0_70] : memref<8x1xf32, #tpu.memory_space<vmem>>, vector<8x1xf32>
    %85 = vector.broadcast %84 : vector<8x1xf32> to vector<8x64xf32>
    %86 = arith.addf %83, %85 : vector<8x64xf32>
    %cst_71 = arith.constant dense<0.000000e+00> : vector<8x8xf32>
    %87 = tpu.matmul %80, %86, %cst_71 {dimension_numbers = #tpu.dot_dimension_numbers<[1], [1], [0], [0], [0, 0, 1, 0], [], []>} : vector<8x64xf32>, vector<8x64xf32>, vector<8x8xf32> -> vector<8x8xf32>
    %cst_72 = arith.constant dense<0xFF800000> : vector<8xf32>
    %88 = vector.multi_reduction <maximumf>, %87, %cst_72 [1] : vector<8x8xf32> to vector<8xf32>
    %89 = vector.shape_cast %88 : vector<8xf32> to vector<8x1xf32>
    %90 = vector.broadcast %89 : vector<8x1xf32> to vector<8x8xf32>
    %91 = arith.subf %87, %90 : vector<8x8xf32>
    %92 = math.exp %91 : vector<8x8xf32>
    %cst_73 = arith.constant dense<0.000000e+00> : vector<8xf32>
    %93 = vector.multi_reduction <add>, %92, %cst_73 [1] : vector<8x8xf32> to vector<8xf32>
    %94 = vector.shape_cast %93 : vector<8xf32> to vector<8x1xf32>
    %95 = tpu.reciprocal %94 {approx = true} : vector<8x1xf32> -> vector<8x1xf32>
    %96 = vector.broadcast %95 : vector<8x1xf32> to vector<8x8xf32>
    %97 = arith.mulf %92, %96 : vector<8x8xf32>
    %cst_74 = arith.constant dense<0.000000e+00> : vector<8x64xf32>
    %98 = tpu.matmul %97, %81, %cst_74 {dimension_numbers = #tpu.dot_dimension_numbers<[1], [0], [0], [1], [0, 0, 1, 1], [], []>} : vector<8x8xf32>, vector<8x64xf32>, vector<8x64xf32> -> vector<8x64xf32>
    %cst_75 = arith.constant dense<0.000000e+00> : vector<64x8xf32>
    %99 = tpu.matmul %0, %98, %cst_75 {dimension_numbers = #tpu.dot_dimension_numbers<[1], [1], [0], [0], [0, 0, 1, 0], [], []>} : vector<64x64xf32>, vector<8x64xf32>, vector<64x8xf32> -> vector<64x8xf32>
    %100 = vector.extract_strided_slice %99 {offsets = [0, 0], sizes = [8, 8], strides = [1, 1]} : vector<64x8xf32> to vector<8x8xf32>
    %c1_76 = arith.constant 1 : index
    %c0_77 = arith.constant 0 : index
    %c0_78 = arith.constant 0 : index
    %c0_79 = arith.constant 0 : index
    %101 = vector.load %arg7[%c1_76, %c0_77, %c0_78, %c0_79] : memref<2x8x8x128xf32, #tpu.memory_space<vmem>>, vector<1x1x8x128xf32>
    %102 = vector.shape_cast %101 : vector<1x1x8x128xf32> to vector<8x128xf32>
    %cst_80 = arith.constant dense<0.000000e+00> : vector<8x128xf32>
    %103 = tpu.matmul %100, %102, %cst_80 {dimension_numbers = #tpu.dot_dimension_numbers<[1], [0], [0], [1], [0, 0, 1, 1], [], []>} : vector<8x8xf32>, vector<8x128xf32>, vector<8x128xf32> -> vector<8x128xf32>
    %104 = arith.addf %70, %103 : vector<8x128xf32>
    %105 = vector.extract_strided_slice %99 {offsets = [8, 0], sizes = [8, 8], strides = [1, 1]} : vector<64x8xf32> to vector<8x8xf32>
    %c1_81 = arith.constant 1 : index
    %c1_82 = arith.constant 1 : index
    %c0_83 = arith.constant 0 : index
    %c0_84 = arith.constant 0 : index
    %106 = vector.load %arg7[%c1_81, %c1_82, %c0_83, %c0_84] : memref<2x8x8x128xf32, #tpu.memory_space<vmem>>, vector<1x1x8x128xf32>
    %107 = vector.shape_cast %106 : vector<1x1x8x128xf32> to vector<8x128xf32>
    %cst_85 = arith.constant dense<0.000000e+00> : vector<8x128xf32>
    %108 = tpu.matmul %105, %107, %cst_85 {dimension_numbers = #tpu.dot_dimension_numbers<[1], [0], [0], [1], [0, 0, 1, 1], [], []>} : vector<8x8xf32>, vector<8x128xf32>, vector<8x128xf32> -> vector<8x128xf32>
    %109 = arith.addf %104, %108 : vector<8x128xf32>
    %110 = vector.extract_strided_slice %99 {offsets = [16, 0], sizes = [8, 8], strides = [1, 1]} : vector<64x8xf32> to vector<8x8xf32>
    %c1_86 = arith.constant 1 : index
    %c2_87 = arith.constant 2 : index
    %c0_88 = arith.constant 0 : index
    %c0_89 = arith.constant 0 : index
    %111 = vector.load %arg7[%c1_86, %c2_87, %c0_88, %c0_89] : memref<2x8x8x128xf32, #tpu.memory_space<vmem>>, vector<1x1x8x128xf32>
    %112 = vector.shape_cast %111 : vector<1x1x8x128xf32> to vector<8x128xf32>
    %cst_90 = arith.constant dense<0.000000e+00> : vector<8x128xf32>
    %113 = tpu.matmul %110, %112, %cst_90 {dimension_numbers = #tpu.dot_dimension_numbers<[1], [0], [0], [1], [0, 0, 1, 1], [], []>} : vector<8x8xf32>, vector<8x128xf32>, vector<8x128xf32> -> vector<8x128xf32>
    %114 = arith.addf %109, %113 : vector<8x128xf32>
    %115 = vector.extract_strided_slice %99 {offsets = [24, 0], sizes = [8, 8], strides = [1, 1]} : vector<64x8xf32> to vector<8x8xf32>
    %c1_91 = arith.constant 1 : index
    %c3_92 = arith.constant 3 : index
    %c0_93 = arith.constant 0 : index
    %c0_94 = arith.constant 0 : index
    %116 = vector.load %arg7[%c1_91, %c3_92, %c0_93, %c0_94] : memref<2x8x8x128xf32, #tpu.memory_space<vmem>>, vector<1x1x8x128xf32>
    %117 = vector.shape_cast %116 : vector<1x1x8x128xf32> to vector<8x128xf32>
    %cst_95 = arith.constant dense<0.000000e+00> : vector<8x128xf32>
    %118 = tpu.matmul %115, %117, %cst_95 {dimension_numbers = #tpu.dot_dimension_numbers<[1], [0], [0], [1], [0, 0, 1, 1], [], []>} : vector<8x8xf32>, vector<8x128xf32>, vector<8x128xf32> -> vector<8x128xf32>
    %119 = arith.addf %114, %118 : vector<8x128xf32>
    %120 = vector.extract_strided_slice %99 {offsets = [32, 0], sizes = [8, 8], strides = [1, 1]} : vector<64x8xf32> to vector<8x8xf32>
    %c1_96 = arith.constant 1 : index
    %c4_97 = arith.constant 4 : index
    %c0_98 = arith.constant 0 : index
    %c0_99 = arith.constant 0 : index
    %121 = vector.load %arg7[%c1_96, %c4_97, %c0_98, %c0_99] : memref<2x8x8x128xf32, #tpu.memory_space<vmem>>, vector<1x1x8x128xf32>
    %122 = vector.shape_cast %121 : vector<1x1x8x128xf32> to vector<8x128xf32>
    %cst_100 = arith.constant dense<0.000000e+00> : vector<8x128xf32>
    %123 = tpu.matmul %120, %122, %cst_100 {dimension_numbers = #tpu.dot_dimension_numbers<[1], [0], [0], [1], [0, 0, 1, 1], [], []>} : vector<8x8xf32>, vector<8x128xf32>, vector<8x128xf32> -> vector<8x128xf32>
    %124 = arith.addf %119, %123 : vector<8x128xf32>
    %125 = vector.extract_strided_slice %99 {offsets = [40, 0], sizes = [8, 8], strides = [1, 1]} : vector<64x8xf32> to vector<8x8xf32>
    %c1_101 = arith.constant 1 : index
    %c5_102 = arith.constant 5 : index
    %c0_103 = arith.constant 0 : index
    %c0_104 = arith.constant 0 : index
    %126 = vector.load %arg7[%c1_101, %c5_102, %c0_103, %c0_104] : memref<2x8x8x128xf32, #tpu.memory_space<vmem>>, vector<1x1x8x128xf32>
    %127 = vector.shape_cast %126 : vector<1x1x8x128xf32> to vector<8x128xf32>
    %cst_105 = arith.constant dense<0.000000e+00> : vector<8x128xf32>
    %128 = tpu.matmul %125, %127, %cst_105 {dimension_numbers = #tpu.dot_dimension_numbers<[1], [0], [0], [1], [0, 0, 1, 1], [], []>} : vector<8x8xf32>, vector<8x128xf32>, vector<8x128xf32> -> vector<8x128xf32>
    %129 = arith.addf %124, %128 : vector<8x128xf32>
    %130 = vector.extract_strided_slice %99 {offsets = [48, 0], sizes = [8, 8], strides = [1, 1]} : vector<64x8xf32> to vector<8x8xf32>
    %c1_106 = arith.constant 1 : index
    %c6_107 = arith.constant 6 : index
    %c0_108 = arith.constant 0 : index
    %c0_109 = arith.constant 0 : index
    %131 = vector.load %arg7[%c1_106, %c6_107, %c0_108, %c0_109] : memref<2x8x8x128xf32, #tpu.memory_space<vmem>>, vector<1x1x8x128xf32>
    %132 = vector.shape_cast %131 : vector<1x1x8x128xf32> to vector<8x128xf32>
    %cst_110 = arith.constant dense<0.000000e+00> : vector<8x128xf32>
    %133 = tpu.matmul %130, %132, %cst_110 {dimension_numbers = #tpu.dot_dimension_numbers<[1], [0], [0], [1], [0, 0, 1, 1], [], []>} : vector<8x8xf32>, vector<8x128xf32>, vector<8x128xf32> -> vector<8x128xf32>
    %134 = arith.addf %129, %133 : vector<8x128xf32>
    %135 = vector.extract_strided_slice %99 {offsets = [56, 0], sizes = [8, 8], strides = [1, 1]} : vector<64x8xf32> to vector<8x8xf32>
    %c1_111 = arith.constant 1 : index
    %c7_112 = arith.constant 7 : index
    %c0_113 = arith.constant 0 : index
    %c0_114 = arith.constant 0 : index
    %136 = vector.load %arg7[%c1_111, %c7_112, %c0_113, %c0_114] : memref<2x8x8x128xf32, #tpu.memory_space<vmem>>, vector<1x1x8x128xf32>
    %137 = vector.shape_cast %136 : vector<1x1x8x128xf32> to vector<8x128xf32>
    %cst_115 = arith.constant dense<0.000000e+00> : vector<8x128xf32>
    %138 = tpu.matmul %135, %137, %cst_115 {dimension_numbers = #tpu.dot_dimension_numbers<[1], [0], [0], [1], [0, 0, 1, 1], [], []>} : vector<8x8xf32>, vector<8x128xf32>, vector<8x128xf32> -> vector<8x128xf32>
    %139 = arith.addf %134, %138 : vector<8x128xf32>
    %cst_116 = arith.constant dense<0.000000e+00> : vector<8xf32>
    %140 = vector.multi_reduction <add>, %139, %cst_116 [1] : vector<8x128xf32> to vector<8xf32>
    %141 = vector.shape_cast %140 : vector<8xf32> to vector<8x1xf32>
    %cst_117 = arith.constant 1.280000e+02 : f32
    %142 = vector.broadcast %cst_117 : f32 to vector<8x1xf32>
    %143 = arith.divf %141, %142 : vector<8x1xf32>
    %144 = vector.broadcast %143 : vector<8x1xf32> to vector<8x128xf32>
    %145 = arith.subf %139, %144 : vector<8x128xf32>
    %146 = arith.mulf %145, %145 : vector<8x128xf32>
    %cst_118 = arith.constant dense<0.000000e+00> : vector<8xf32>
    %147 = vector.multi_reduction <add>, %146, %cst_118 [1] : vector<8x128xf32> to vector<8xf32>
    %148 = vector.shape_cast %147 : vector<8xf32> to vector<8x1xf32>
    %cst_119 = arith.constant 1.280000e+02 : f32
    %149 = vector.broadcast %cst_119 : f32 to vector<8x1xf32>
    %150 = arith.divf %148, %149 : vector<8x1xf32>
    %c0_120 = arith.constant 0 : index
    %c0_121 = arith.constant 0 : index
    %151 = vector.load %arg8[%c0_120, %c0_121] : memref<8x2xf32, #tpu.memory_space<vmem>>, vector<8x1xf32>
    %cst_122 = arith.constant 9.99999974E-5 : f32
    %152 = vector.broadcast %cst_122 : f32 to vector<8x1xf32>
    %153 = arith.addf %150, %152 : vector<8x1xf32>
    %154 = math.rsqrt %153 : vector<8x1xf32>
    %155 = arith.mulf %151, %154 : vector<8x1xf32>
    %c0_123 = arith.constant 0 : index
    %c1_124 = arith.constant 1 : index
    %156 = vector.load %arg8[%c0_123, %c1_124] : memref<8x2xf32, #tpu.memory_space<vmem>>, vector<8x1xf32>
    %157 = arith.mulf %155, %143 : vector<8x1xf32>
    %158 = arith.subf %156, %157 : vector<8x1xf32>
    %159 = vector.broadcast %155 : vector<8x1xf32> to vector<8x128xf32>
    %160 = arith.mulf %159, %139 : vector<8x128xf32>
    %161 = vector.broadcast %158 : vector<8x1xf32> to vector<8x128xf32>
    %162 = arith.addf %160, %161 : vector<8x128xf32>
    %cst_125 = arith.constant 0.000000e+00 : f32
    %163 = vector.broadcast %cst_125 : f32 to vector<8x128xf32>
    %164 = arith.cmpf oge, %162, %163 : vector<8x128xf32>
    %cst_126 = arith.constant 0.00999999977 : f32
    %165 = vector.broadcast %cst_126 : f32 to vector<8x128xf32>
    %166 = arith.mulf %165, %162 : vector<8x128xf32>
    %167 = arith.select %164, %162, %166 : vector<8x128xi1>, vector<8x128xf32>
    %c0_127 = arith.constant 0 : index
    %c0_128 = arith.constant 0 : index
    %168 = vector.load %arg9[%c0_127, %c0_128] : memref<8x8xf32, #tpu.memory_space<vmem>>, vector<8x8xf32>
    %cst_129 = arith.constant dense<0.000000e+00> : vector<8x128xf32>
    %169 = tpu.matmul %168, %167, %cst_129 {dimension_numbers = #tpu.dot_dimension_numbers<[1], [0], [0], [1], [0, 0, 1, 1], [], []>} : vector<8x8xf32>, vector<8x128xf32>, vector<8x128xf32> -> vector<8x128xf32>
    %c0_130 = arith.constant 0 : index
    %c0_131 = arith.constant 0 : index
    %170 = vector.load %arg10[%c0_130, %c0_131] : memref<8x1xf32, #tpu.memory_space<vmem>>, vector<8x1xf32>
    %171 = vector.broadcast %170 : vector<8x1xf32> to vector<8x128xf32>
    %172 = arith.addf %169, %171 : vector<8x128xf32>
    %cst_132 = arith.constant 0.000000e+00 : f32
    %173 = vector.broadcast %cst_132 : f32 to vector<8x128xf32>
    %174 = arith.cmpf oge, %172, %173 : vector<8x128xf32>
    %cst_133 = arith.constant 0.00999999977 : f32
    %175 = vector.broadcast %cst_133 : f32 to vector<8x128xf32>
    %176 = arith.mulf %175, %172 : vector<8x128xf32>
    %177 = arith.select %174, %172, %176 : vector<8x128xi1>, vector<8x128xf32>
    %c0_134 = arith.constant 0 : index
    %c0_135 = arith.constant 0 : index
    %178 = vector.load %arg11[%c0_134, %c0_135] : memref<4x8xf32, #tpu.memory_space<vmem>>, vector<4x8xf32>
    %cst_136 = arith.constant dense<0.000000e+00> : vector<4x128xf32>
    %179 = tpu.matmul %178, %177, %cst_136 {dimension_numbers = #tpu.dot_dimension_numbers<[1], [0], [0], [1], [0, 0, 1, 1], [], []>} : vector<4x8xf32>, vector<8x128xf32>, vector<4x128xf32> -> vector<4x128xf32>
    %c0_137 = arith.constant 0 : index
    %c0_138 = arith.constant 0 : index
    %180 = vector.load %arg12[%c0_137, %c0_138] : memref<4x1xf32, #tpu.memory_space<vmem>>, vector<4x1xf32>
    %181 = vector.broadcast %180 : vector<4x1xf32> to vector<4x128xf32>
    %182 = arith.addf %179, %181 : vector<4x128xf32>
    %c0_139 = arith.constant 0 : index
    %c0_140 = arith.constant 0 : index
    %183 = vector.load %arg13[%c0_139, %c0_140] : memref<4x128xf32, #tpu.memory_space<vmem>>, vector<4x128xf32>
    tpu.vector_store %arg13[%c0_139, %c0_140], %182 {strides = array<i32>} : memref<4x128xf32, #tpu.memory_space<vmem>>, vector<4x128xf32>,
    return
  }
}

</mosaic_0001>

<bundles_post_ra>
// kernel: multi_head_attention_similar_kv.1
= control target key start
LH: loop header
LB: loop body
LE: loop exit
PB: predicated region body
PF: predicated region fallthrough
CT: control target
= control target key end

     0   :  { %vm75_vm0 = vcmask 1043456   ;;  %vm68_vm1 = vcmask 31744   ;;  %v2719_v2 = vmov 0.0   ;;  %vm165_vm2 = vcmask 1045504   ;;  %s2722_s26 = smov 1   ;;  %s3105_s0 = inlined_call_operand.vmem [shape: f32[2,4,64], index: 0, kind: input, shape index: {}]   ;;  %s3106_s2 = inlined_call_operand.vmem [shape: f32[16,4], index: 2, kind: input, shape index: {}]   ;;  %s3107_s1 = inlined_call_operand.vmem [shape: f32[2,6,64], index: 1, kind: input, shape index: {}]   ;;  %s3108_s5 = inlined_call_operand.vmem [shape: f32[8,1], index: 5, kind: input, shape index: {}]   ;;  %s3109_s4 = inlined_call_operand.vmem [shape: f32[8,6], index: 4, kind: input, shape index: {}]   ;;  %s3110_s3 = inlined_call_operand.vmem [shape: f32[16,1], index: 3, kind: input, shape index: {}]   ;;  %s3111_s6 = inlined_call_operand.vmem [shape: f32[64,64], index: 6, kind: input, shape index: {}]   ;;  %s3112_s7 = inlined_call_operand.vmem [shape: f32[2,8,8,128], index: 7, kind: input, shape index: {}]   ;;  %s3113_s10 = inlined_call_operand.vmem [shape: f32[8,1], index: 10, kind: input, shape index: {}]   ;;  %s3114_s8 = inlined_call_operand.vmem [shape: f32[8,2], index: 8, kind: input, shape index: {}]   ;;  %s3115_s9 = inlined_call_operand.vmem [shape: f32[8,8], index: 9, kind: input, shape index: {}]   ;;  %s3116_s12 = inlined_call_operand.vmem [shape: f32[4,1], index: 12, kind: input, shape index: {}]   ;;  %s3117_s11 = inlined_call_operand.vmem [shape: f32[4,8], index: 11, kind: input, shape index: {}]   ;;  %s3118_s13 = inlined_call_operand.vmem [shape: f32[4,128], index: 13, kind: output, shape index: {}]  }
   0x1   :  { %v52_v0 = vld [vmem:[%s3105_s0] sm:$0xf]  ;;  %2527 = vmatprep.subr.mxu1 %v2719_v2  ;;  %v2807_v3 = vld [vmem:[%s3106_s2 + $0x8] sm:$0xff]  ;;  %v2720_v5 = vmov 0   ;;  %vm2721_vm3 = vmmov 0   ;;  %vm161_vm4 = vcmask 48128  }
   0x2   :  { %v2800_v1 = vld [vmem:[%s3106_s2] sm:$0xff]  ;;  %2512 = vmatprep.subr.msk.mxu0 %vm75_vm0, %v52_v0  ;;  %2705 = vset.pattern.permute.xlu0 %v2720_v5  ;;  %v57_v9 = vld [vmem:[%s3110_s3 + $0x8] sm:$0xff]  ;;  %vm239_vm5 = vcmask 523264   ;;  %vm316_vm6 = vcmask 64512   ;;  %v2881_v36 = vld [vmem:[%s3111_s6 + $0x10] sm:$0xff] }
   0x3   :  { %2514 = vmatprep.mubr.msk.f32.mxu0 %vm68_vm1, %v2800_v1  ;;  %v53_v4 = vld [vmem:[%s3107_s1] sm:$0x3f]  ;;  %2513 = vmatpush3.msk.msra.mxu0 %vm75_vm0, %v52_v0  ;;  %v2876_v35 = vld [vmem:[%s3111_s6 + $0x8] sm:$0xff]  ;;  %v2891_v37 = vld [vmem:[%s3111_s6 + $0x18] sm:$0xff] }
   0x4   :  { %v155_v6 = vld [vmem:[%s3108_s5] sm:$0xff]  ;;  %2515 = vmatmul.mubr.msk.f32.vlgmr.msra.gmra.mrb[0].mxu0 %vm68_vm1, %v2807_v3  ;;  %2517 = vmatprep.subr.mxu0 %v2719_v2  ;;  %v2907_v39 = vld [vmem:[%s3111_s6 + $0x28] sm:$0xff]  ;;  %v2912_v40 = vld [vmem:[%s3111_s6 + $0x30] sm:$0xff] }
   0x5   :  { %2518 = vmatpush3.msk.msra.mxu0 %vm165_vm2, %v53_v4  ;;  %2519 = vmatprep.mubr.msk.f32.mxu0 %vm2721_vm3, %v2719_v2  ;;  %v2828_v7 = vld [vmem:[%s3109_s4] sm:$0xff]  ;;  %v2921_v41 = vld [vmem:[%s3111_s6 + $0x38] sm:$0xff]  ;;  %v2404_v42 = vld [vmem:[%s3107_s1 + $0x8] sm:$0x3f] }
   0x6   :  { %158 = vperm.xlu0 %2705, %v155_v6   ;;  %2522 = vmatprep.subr.mxu0 %v2719_v2  ;;  %v56_v8 = vld [vmem:[%s3110_s3] sm:$0xff]  ;;  %v2388_v43 = vld [vmem:[%s3112_s7 + $0x8] sm:$0xff]  ;;  %v2391_v49 = vld [vmem:[%s3112_s7 + $0x10] sm:$0xff] }
   0x7   :  { %2529 = vmatprep.mubr.msk.f32.mxu1 %vm2721_vm3, %v2719_v2  ;;  %2706 = vset.pattern.permute.xlu1 %v2720_v5  ;;  %v2864_v31 = vld [vmem:[%s3111_s6] sm:$0xff]  ;;  %v2393_v54 = vld [vmem:[%s3112_s7 + $0x18] sm:$0xff]  ;;  %v2397_v63 = vld [vmem:[%s3112_s7 + $0x28] sm:$0xff] }
   0x8   :  { %2520 = vmatmul.mubr.msk.f32.vlgmr.msra.gmra.mrb[2].mxu0 %vm161_vm4, %v2828_v7  ;;  %v2403_v32 = vld [vmem:[%s3105_s0 + $0x4] sm:$0xf]  ;;  %v2399_v0 = vld [vmem:[%s3112_s7 + $0x30] sm:$0xff] }
   0x9   :  { %2524 = vmatprep.mubr.msk.f32.mxu0 %vm2721_vm3, %v2719_v2  ;;  %v2897_v38 = vld [vmem:[%s3111_s6 + $0x20] sm:$0xff] }
   0xa   :  { %60 = vperm.xlu0 %2705, %v56_v8   ;;  %v533_v44 = vld [vmem:[%s3112_s7] sm:$0xff] }
   0xb   :  { %v2395_v60 = vld [vmem:[%s3112_s7 + $0x20] sm:$0xff] }
   0xe   :  { %65 = vperm.xlu0 %2705, %v57_v9  }
  0x85   :  { %v2844_v10 = vpop.permute.xlu0 %158 }
  0x89   :  { %v2846_v11 = vpop.permute.xlu0 %60 }
  0x8d   :  { %v2848_v12 = vpop.permute.xlu0 %65 }
  0xd7   :  { %v2516_v13 = vpop.f32.mrb[0].mxu0 }
  0xd8   :  { %v151_v14 = vadd.f32 %v2516_v13, %v2848_v12  ;;  %v145_v15 = vpop.f32.mrb[1].mxu0 }
  0xd9   :  { %v146_v19 = vadd.f32 %v145_v15, %v2846_v11 }
  0xda   :  { %2528 = vmatpush3.msra.mxu1 %v151_v14 }
  0xdb   :  { %v235_v16 = vpop.f32.mrb[2].mxu0  ;;  %2546 = vmatprep.subr.mxu1 %v2719_v2 }
  0xdc   :  { %v236_v17 = vadd.f32 %v235_v16, %v2844_v10  ;;  %v2521_v18 = vpop.f32.mrb[3].mxu0 }
  0xdd   :  { %v2422_v18 = vld [vmem:[%s3112_s7 + $0x40] sm:$0xff] }
  0xde   :  { %2523 = vmatpush3.xpose.msk.msra.mxu0 %vm239_vm5, %v236_v17 }
  0xe1   :  { %2525 = vmatmul.mubr.msk.f32.vlgmr.msra.gmra.mrb[4].mxu0 %vm239_vm5, %v146_v19 }
  0xe2   :  { %2534 = vmatprep.mubr.msk.f32.mxu0 %vm239_vm5, %v2864_v31 }
 0x1b4   :  { %v312_v20 = vpop.f32.mrb[4].mxu0 }
 0x1b5   :  { %v2526_v21 = vpop.f32.mrb[5].mxu0  ;;  %v317_v22 = vsel %vm316_vm6, %v312_v20, -inf }
 0x1b6   :  { %318 = vmax.xlane.f32.xlu1 %v317_v22 }
 0x243   :  { %v319_v23 = vpop.xlane.xlu1 %318 }
 0x244   :  { %v320_v24 = vsub.f32 %v312_v20, %v319_v23  ;;  %v2424_v20 = vld [vmem:[%s3112_s7 + $0x48] sm:$0xff] }
 0x246   :  { %v321_v25 = vmul.f32 1.442695, %v320_v24  ;;  %v2426_v24 = vld [vmem:[%s3112_s7 + $0x50] sm:$0xff] }
 0x248   :  { %2709 = vpow2.f32 %v321_v25 }
 0x252   :  { %v2710_v26 = vpop.eup %2709 }
 0x253   :  { %v323_v27 = vsel %vm316_vm6, %v2710_v26, 0.0 }
 0x254   :  { %324 = vadd.xlane.f32.xlu1 %v323_v27 }
 0x2e1   :  { %v325_v28 = vpop.xlane.xlu1 %324 }
 0x2e2   :  { %2711 = vrcp.f32 %v325_v28 }
 0x2ec   :  { %v2712_v29 = vpop.eup %2711 }
 0x2ed   :  { %v327_v30 = vmul.f32 %v2712_v29, %v2710_v26  ;;  %v2428_v29 = vld [vmem:[%s3112_s7 + $0x58] sm:$0xff] }
 0x2ef   :  { %2530 = vmatmul.mubr.msk.f32.vlgmr.msra.gmra.mrb[0].mxu1 %vm316_vm6, %v327_v30  ;;  %v2430_v30 = vld [vmem:[%s3112_s7 + $0x60] sm:$0xff] }
 0x2f0   :  { %2548 = vmatprep.mubr.msk.f32.mxu1 %vm2721_vm3, %v2719_v2  ;;  %2547 = vmatpush3.msra.mxu1 %v2388_v43  ;;  %v2178_v43 = vld [vmem:[%s3114_s8] sm:$0xff] }
 0x2f1   :  { %2551 = vmatprep.subr.mxu1 %v2719_v2 }
 0x3c2   :  { %v397_v33 = vpop.f32.mrb[0].mxu1 }
 0x3c3   :  { %v2531_v34 = vpop.f32.mrb[1].mxu1  ;;  %2532 = vmatprep.subr.msk.mxu0 %vm239_vm5, %v397_v33 }
 0x3c4   :  { %2533 = vmatpush3.xpose.msk.msra.mxu0 %vm239_vm5, %v397_v33  ;;  %v2436_v33 = vld [vmem:[%s3112_s7 + $0x78] sm:$0xff] }
 0x3c5   :  { %2586 = vmatprep.subr.msk.mxu0 %vm75_vm0, %v2403_v32 }
 0x3c7   :  { %2535 = vmatmul.mubr.msk.f32.vlgmr.msra.gmra.mrb[6].mxu0 %vm239_vm5, %v2876_v35 }
 0x3c8   :  { %2537 = vmatprep.mubr.msk.f32.mxu0 %vm239_vm5, %v2881_v36  ;;  %2587 = vmatpush3.msk.msra.mxu0 %vm75_vm0, %v2403_v32  ;;  %v2434_v32 = vld [vmem:[%s3112_s7 + $0x70] sm:$0xff] }
 0x3c9   :  { %2591 = vmatprep.subr.mxu0 %v2719_v2 }
 0x3cb   :  { %2538 = vmatmul.mubr.msk.f32.gmra.mrb[8].mxu0 %vm239_vm5, %v2891_v37 }
 0x3cc   :  { %2540 = vmatprep.mubr.msk.f32.mxu0 %vm239_vm5, %v2897_v38 }
 0x3cf   :  { %2541 = vmatmul.mubr.msk.f32.gmra.mrb[10].mxu0 %vm239_vm5, %v2907_v39 }
 0x3d0   :  { %2543 = vmatprep.mubr.msk.f32.mxu0 %vm239_vm5, %v2912_v40 }
 0x3d3   :  { %2544 = vmatmul.mubr.msk.f32.gmra.mrb[12].mxu0 %vm239_vm5, %v2921_v41 }
 0x3d4   :  { %2588 = vmatprep.mubr.msk.f32.mxu0 %vm68_vm1, %v2800_v1  ;;  %v2401_v1 = vld [vmem:[%s3112_s7 + $0x38] sm:$0xff] }
 0x3d7   :  { %2589 = vmatmul.mubr.msk.f32.vlgmr.msra.gmra.mrb[14].mxu0 %vm68_vm1, %v2807_v3 }
 0x3d8   :  { %2592 = vmatpush3.msk.msra.mxu0 %vm165_vm2, %v2404_v42  ;;  %2593 = vmatprep.mubr.msk.f32.mxu0 %vm2721_vm3, %v2719_v2 }
 0x3d9   :  { %2596 = vmatprep.subr.mxu0 %v2719_v2 }
 0x3db   :  { %2594 = vmatmul.mubr.msk.f32.vlgmr.msra.gmra.mrb[16].mxu0 %vm161_vm4, %v2828_v7 }
 0x3dc   :  { %2598 = vmatprep.mubr.msk.f32.mxu0 %vm2721_vm3, %v2719_v2 }
 0x49a   :  { %v2536_v45 = vpop.f32.mrb[6].mxu0 }
 0x49b   :  { %v494_v46 = vpop.f32.mrb[7].mxu0  ;;  %2549 = vmatmul.mubr.msk.f32.vlgmr.msra.gmra.mrb[2].mxu1 %vm316_vm6, %v2536_v45 }
 0x49c   :  { %2552 = vmatpush3.msra.mxu1 %v533_v44  ;;  %2553 = vmatprep.mubr.msk.f32.mxu1 %vm2721_vm3, %v2719_v2 }
 0x49d   :  { %2556 = vmatprep.subr.mxu1 %v2719_v2 }
 0x49e   :  { %v2539_v47 = vpop.f32.mrb[8].mxu0 }
 0x49f   :  { %v504_v48 = vpop.f32.mrb[9].mxu0 }
 0x4a2   :  { %v2542_v50 = vpop.f32.mrb[10].mxu0 }
 0x4a3   :  { %v514_v51 = vpop.f32.mrb[11].mxu0  ;;  %2554 = vmatmul.mubr.msk.f32.vlgmr.msra.gmra.mrb[2].mxu1 %vm316_vm6, %v494_v46 }
 0x4a4   :  { %2557 = vmatpush3.msra.mxu1 %v2391_v49  ;;  %2558 = vmatprep.mubr.msk.f32.mxu1 %vm2721_vm3, %v2719_v2 }
 0x4a5   :  { %2561 = vmatprep.subr.mxu1 %v2719_v2 }
 0x4a6   :  { %v2545_v52 = vpop.f32.mrb[12].mxu0 }
 0x4a7   :  { %v524_v53 = vpop.f32.mrb[13].mxu0 }
 0x4aa   :  { %v2590_v55 = vpop.f32.mrb[14].mxu0 }
 0x4ab   :  { %2559 = vmatmul.mubr.msk.f32.vlgmr.msra.gmra.mrb[2].mxu1 %vm316_vm6, %v504_v48  ;;  %v1211_v56 = vpop.f32.mrb[15].mxu0  ;;  %v1217_v62 = vadd.f32 %v2590_v55, %v2848_v12  ;;  %v2204_v12 = vld [vmem:[%s3113_s10] sm:$0xff] }
 0x4ac   :  { %2562 = vmatpush3.msra.mxu1 %v2393_v54  ;;  %2563 = vmatprep.mubr.msk.f32.mxu1 %vm2721_vm3, %v2719_v2  ;;  %v1212_v61 = vadd.f32 %v1211_v56, %v2846_v11  ;;  %v2203_v55 = vld [vmem:[%s3115_s9] sm:$0xff] }
 0x4ad   :  { %2566 = vmatprep.subr.mxu1 %v2719_v2 }
 0x4ae   :  { %v1289_v57 = vpop.f32.mrb[16].mxu0 }
 0x4af   :  { %v1290_v58 = vadd.f32 %v1289_v57, %v2844_v10  ;;  %v2595_v59 = vpop.f32.mrb[17].mxu0 }
 0x4b1   :  { %2597 = vmatpush3.xpose.msk.msra.mxu0 %vm239_vm5, %v1290_v58 }
 0x4b2   :  { %2601 = vmatprep.subr.mxu0 %v2719_v2 }
 0x4b3   :  { %2564 = vmatmul.mubr.msk.f32.vlgmr.msra.gmra.mrb[2].mxu1 %vm316_vm6, %v2539_v47  ;;  %v2723_v47 = vmov 1  }
 0x4b4   :  { %2599 = vmatmul.mubr.msk.f32.vlgmr.msra.gmra.mrb[18].mxu0 %vm239_vm5, %v1212_v61  ;;  %2567 = vmatpush3.msra.mxu1 %v2395_v60 }
 0x4b5   :  { %2602 = vmatpush3.msra.mxu0 %v1217_v62  ;;  %2568 = vmatprep.mubr.msk.f32.mxu1 %vm2721_vm3, %v2719_v2  ;;  %v2286_v62 = vld [vmem:[%s3117_s11] sm:$0xf] }
 0x4b6   :  { %2571 = vmatprep.subr.mxu1 %v2719_v2  ;;  %2603 = vmatprep.mubr.msk.f32.mxu0 %vm2721_vm3, %v2719_v2 }
 0x4bb   :  { %2569 = vmatmul.mubr.msk.f32.vlgmr.msra.gmra.mrb[2].mxu1 %vm316_vm6, %v514_v51 }
 0x4bc   :  { %2572 = vmatpush3.msra.mxu1 %v2397_v63  ;;  %2573 = vmatprep.mubr.msk.f32.mxu1 %vm2721_vm3, %v2719_v2 }
 0x4bd   :  { %2576 = vmatprep.subr.mxu1 %v2719_v2 }
 0x4c3   :  { %2574 = vmatmul.mubr.msk.f32.vlgmr.msra.gmra.mrb[2].mxu1 %vm316_vm6, %v2542_v50 }
 0x4c4   :  { %2577 = vmatpush3.msra.mxu1 %v2399_v0  ;;  %2578 = vmatprep.mubr.msk.f32.mxu1 %vm2721_vm3, %v2719_v2 }
 0x4c5   :  { %2581 = vmatprep.subr.mxu1 %v2719_v2 }
 0x4cb   :  { %2579 = vmatmul.mubr.msk.f32.vlgmr.msra.gmra.mrb[2].mxu1 %vm316_vm6, %v524_v53 }
 0x4cc   :  { %2582 = vmatpush3.msra.mxu1 %v2401_v1  ;;  %2583 = vmatprep.mubr.msk.f32.mxu1 %vm2721_vm3, %v2719_v2 }
 0x4cd   :  { %2620 = vmatprep.subr.mxu1 %v2719_v2 }
 0x4d3   :  { %2584 = vmatmul.mubr.msk.f32.vlgmr.msra.gmra.mrb[2].mxu1 %vm316_vm6, %v2545_v52 }
 0x4d4   :  { %2622 = vmatprep.mubr.msk.f32.mxu1 %vm2721_vm3, %v2719_v2  ;;  %2621 = vmatpush3.msra.mxu1 %v2422_v18 }
 0x4d5   :  { %2625 = vmatprep.subr.mxu1 %v2719_v2 }
 0x587   :  { %v1365_v3 = vpop.f32.mrb[18].mxu0 }
 0x588   :  { %v2600_v4 = vpop.f32.mrb[19].mxu0  ;;  %v1369_v6 = vsel %vm316_vm6, %v1365_v3, -inf }
 0x589   :  { %1370 = vmax.xlane.f32.xlu1 %v1369_v6 }
 0x616   :  { %v1371_v7 = vpop.xlane.xlu1 %1370 }
 0x617   :  { %v1372_v8 = vsub.f32 %v1365_v3, %v1371_v7 }
 0x619   :  { %v1373_v9 = vmul.f32 1.442695, %v1372_v8 }
 0x61b   :  { %2713 = vpow2.f32 %v1373_v9 }
 0x625   :  { %v2714_v10 = vpop.eup %2713 }
 0x626   :  { %v1375_v11 = vsel %vm316_vm6, %v2714_v10, 0.0 }
 0x627   :  { %1376 = vadd.xlane.f32.xlu0 %v1375_v11 }
 0x63d   :  { %2207 = vperm.xlu0 %2705, %v2204_v12  }
 0x6b4   :  { %v1377_v13 = vpop.xlane.xlu0 %1376 }
 0x6b5   :  { %2715 = vrcp.f32 %v1377_v13 }
 0x6bc   :  { %v2208_v57 = vpop.permute.xlu0 %2207 }
 0x6bf   :  { %v2716_v14 = vpop.eup %2715 }
 0x6c0   :  { %v1379_v15 = vmul.f32 %v2716_v14, %v2714_v10 }
 0x6c2   :  { %2604 = vmatmul.mubr.msk.f32.vlgmr.msra.gmra.mrb[20].mxu0 %vm316_vm6, %v1379_v15 }
 0x6c3   :  { %2608 = vmatprep.mubr.msk.f32.mxu0 %vm239_vm5, %v2864_v31  ;;  %v2432_v31 = vld [vmem:[%s3112_s7 + $0x68] sm:$0xff] }
 0x795   :  { %v1449_v16 = vpop.f32.mrb[20].mxu0 }
 0x796   :  { %v2605_v17 = vpop.f32.mrb[21].mxu0  ;;  %2606 = vmatprep.subr.msk.mxu0 %vm239_vm5, %v1449_v16 }
 0x797   :  { %2607 = vmatpush3.xpose.msk.msra.mxu0 %vm239_vm5, %v1449_v16 }
 0x798   :  { %2660 = vmatprep.subr.mxu0 %v2719_v2 }
 0x79a   :  { %2609 = vmatmul.mubr.msk.f32.vlgmr.msra.gmra.mrb[22].mxu0 %vm239_vm5, %v2876_v35 }
 0x79b   :  { %2611 = vmatprep.mubr.msk.f32.mxu0 %vm239_vm5, %v2881_v36 }
 0x79e   :  { %2612 = vmatmul.mubr.msk.f32.gmra.mrb[24].mxu0 %vm239_vm5, %v2891_v37 }
 0x79f   :  { %2614 = vmatprep.mubr.msk.f32.mxu0 %vm239_vm5, %v2897_v38 }
 0x7a2   :  { %2615 = vmatmul.mubr.msk.f32.gmra.mrb[26].mxu0 %vm239_vm5, %v2907_v39 }
 0x7a3   :  { %2617 = vmatprep.mubr.msk.f32.mxu0 %vm239_vm5, %v2912_v40 }
 0x7a6   :  { %2618 = vmatmul.mubr.msk.f32.gmra.mrb[28].mxu0 %vm239_vm5, %v2921_v41 }
 0x7a7   :  { %2662 = vmatprep.mubr.msk.f32.mxu0 %vm2721_vm3, %v2719_v2 }
 0x86d   :  { %v2610_v19 = vpop.f32.mrb[22].mxu0 }
 0x86e   :  { %v1522_v21 = vpop.f32.mrb[23].mxu0 }
 0x86f   :  { %2623 = vmatmul.mubr.msk.f32.vlgmr.msra.gmra.mrb[2].mxu1 %vm316_vm6, %v1522_v21 }
 0x870   :  { %2626 = vmatpush3.msra.mxu1 %v2424_v20  ;;  %2627 = vmatprep.mubr.msk.f32.mxu1 %vm2721_vm3, %v2719_v2 }
 0x871   :  { %v2613_v22 = vpop.f32.mrb[24].mxu0  ;;  %2630 = vmatprep.subr.mxu1 %v2719_v2 }
 0x872   :  { %v1532_v23 = vpop.f32.mrb[25].mxu0 }
 0x875   :  { %v2616_v25 = vpop.f32.mrb[26].mxu0 }
 0x876   :  { %v1542_v26 = vpop.f32.mrb[27].mxu0 }
 0x877   :  { %2628 = vmatmul.mubr.msk.f32.vlgmr.msra.gmra.mrb[2].mxu1 %vm316_vm6, %v2610_v19 }
 0x878   :  { %2631 = vmatpush3.msra.mxu1 %v2426_v24  ;;  %2632 = vmatprep.mubr.msk.f32.mxu1 %vm2721_vm3, %v2719_v2 }
 0x879   :  { %2635 = vmatprep.subr.mxu1 %v2719_v2  ;;  %v2619_v27 = vpop.f32.mrb[28].mxu0 }
 0x87a   :  { %v1552_v28 = vpop.f32.mrb[29].mxu0 }
 0x87f   :  { %2633 = vmatmul.mubr.msk.f32.vlgmr.msra.gmra.mrb[2].mxu1 %vm316_vm6, %v1532_v23 }
 0x880   :  { %2636 = vmatpush3.msra.mxu1 %v2428_v29  ;;  %2637 = vmatprep.mubr.msk.f32.mxu1 %vm2721_vm3, %v2719_v2 }
 0x881   :  { %2640 = vmatprep.subr.mxu1 %v2719_v2 }
 0x887   :  { %2638 = vmatmul.mubr.msk.f32.vlgmr.msra.gmra.mrb[2].mxu1 %vm316_vm6, %v2613_v22 }
 0x888   :  { %2641 = vmatpush3.msra.mxu1 %v2430_v30  ;;  %2642 = vmatprep.mubr.msk.f32.mxu1 %vm2721_vm3, %v2719_v2 }
 0x889   :  { %2645 = vmatprep.subr.mxu1 %v2719_v2 }
 0x88f   :  { %2643 = vmatmul.mubr.msk.f32.vlgmr.msra.gmra.mrb[2].mxu1 %vm316_vm6, %v1542_v26 }
 0x890   :  { %2646 = vmatpush3.msra.mxu1 %v2432_v31  ;;  %2647 = vmatprep.mubr.msk.f32.mxu1 %vm2721_vm3, %v2719_v2 }
 0x891   :  { %2650 = vmatprep.subr.mxu1 %v2719_v2 }
 0x897   :  { %2648 = vmatmul.mubr.msk.f32.vlgmr.msra.gmra.mrb[2].mxu1 %vm316_vm6, %v2616_v25 }
 0x898   :  { %2651 = vmatpush3.msra.mxu1 %v2434_v32  ;;  %2652 = vmatprep.mubr.msk.f32.mxu1 %vm2721_vm3, %v2719_v2 }
 0x899   :  { %2655 = vmatprep.subr.mxu1 %v2719_v2 }
 0x89f   :  { %2653 = vmatmul.mubr.msk.f32.vlgmr.msra.gmra.mrb[2].mxu1 %vm316_vm6, %v1552_v28 }
 0x8a0   :  { %2656 = vmatpush3.msra.mxu1 %v2436_v33  ;;  %2657 = vmatprep.mubr.msk.f32.mxu1 %vm2721_vm3, %v2719_v2 }
 0x8a7   :  { %2658 = vmatmul.mubr.msk.f32.vlgmr.msra.gmra.mrb[2].mxu1 %vm316_vm6, %v2619_v27 }
 0x97a   :  { %v2164_v34 = vpop.f32.mrb[2].mxu1 }
 0x97b   :  { %2169 = vadd.xlane.f32.xlu1 %v2164_v34  ;;  %v2659_v35 = vpop.f32.mrb[3].mxu1 }
 0xa08   :  { %v2170_v36 = vpop.xlane.xlu1 %2169 }
 0xa09   :  { %v2172_v37 = vmul.f32 0.0078125, %v2170_v36 }
 0xa0b   :  { %v2173_v38 = vsub.f32 %v2164_v34, %v2172_v37 }
 0xa0d   :  { %v2174_v39 = vmul.f32 %v2173_v38, %v2173_v38 }
 0xa0f   :  { %2175 = vadd.xlane.f32.xlu1 %v2174_v39 }
 0xa9c   :  { %v2176_v40 = vpop.xlane.xlu1 %2175 }
 0xa9d   :  { %v2177_v41 = vmul.f32 0.0078125, %v2176_v40 }
 0xa9f   :  { %v2179_v42 = vadd.f32 0.0001, %v2177_v41 }
 0xaa1   :  { %2717 = vrsqrt.f32 %v2179_v42 }
 0xaab   :  { %v2718_v44 = vpop.eup %2717 }
 0xaac   :  { %v2181_v45 = vmul.f32 %v2718_v44, %v2178_v43 }
 0xaae   :  { %v2182_v46 = vmul.f32 %v2181_v45, %v2172_v37 }
 0xab0   :  { %2184 = vrot.lane.b32.xlu1 %v2182_v46, %s2722_s26 }
 0xab4   :  { %2190 = vperm.xlu1 %2706, %v2181_v45  }
 0xab8   :  { %2707 = vset.pattern.permute.xlu1 %v2723_v47 }
 0xb22   :  { %v2185_v48 = vpop.permute.xlu1 %2184 }
 0xb23   :  { %v2187_v49 = vsub.f32 %v2178_v43, %v2185_v48 }
 0xb25   :  { %2196 = vperm.xlu1 %2707, %v2187_v49  }
 0xb29   :  { %2708 = vset.pattern.permute.xlu1 %v2720_v5  ;;  %v2287_v5 = vld [vmem:[%s3116_s12] sm:$0xf] }
 0xb2a   :  { %2290 = vperm.xlu1 %2708, %v2287_v5  }
 0xb33   :  { %v2191_v50 = vpop.permute.xlu1 %2190 }
 0xb34   :  { %v2193_v51 = vmul.f32 %v2191_v50, %v2164_v34 }
 0xba4   :  { %v2197_v52 = vpop.permute.xlu1 %2196 }
 0xba5   :  { %v2199_v53 = vadd.f32 %v2197_v52, %v2193_v51 }
 0xba7   :  { %vm2200_vm7 = vcmp.ge.f32.partialorder %v2199_v53, 0.0  ;;  %v2201_v54 = vmul.f32 0.01, %v2199_v53 }
 0xba9   :  { %v2202_v56 = vsel %vm2200_vm7, %v2199_v53, %v2201_v54 }
 0xbaa   :  { %2661 = vmatpush3.msra.mxu0 %v2202_v56 }
 0xbab   :  { %2663 = vmatmul.mubr.msk.f32.vlgmr.msra.gmra.mrb[30].mxu0 %vm316_vm6, %v2203_v55  ;;  %2665 = vmatprep.subr.mxu0 %v2719_v2 }
 0xbac   :  { %2667 = vmatprep.mubr.msk.f32.mxu0 %vm2721_vm3, %v2719_v2  ;;  %v2291_v2 = vpop.permute.xlu1 %2290 }
 0xc7e   :  { %v2279_v58 = vpop.f32.mrb[30].mxu0 }
 0xc7f   :  { %v2280_v59 = vadd.f32 %v2279_v58, %v2208_v57  ;;  %v2664_v60 = vpop.f32.mrb[31].mxu0 }
 0xc81   :  { %vm2283_vm8 = vcmp.ge.f32.partialorder %v2280_v59, 0.0  ;;  %v2284_v61 = vmul.f32 0.01, %v2280_v59 }
 0xc83   :  { %v2285_v63 = vsel %vm2283_vm8, %v2280_v59, %v2284_v61 }
 0xc84   :  { %2666 = vmatpush3.msra.mxu0 %v2285_v63 }
 0xc85   :  { %2668 = vmatmul.mubr.msk.f32.vlgmr.msra.gmra.mrb[32].mxu0 %vm316_vm6, %v2286_v62 }
 0xd58   :  { %v2362_v0 = vpop.f32.mrb[32].mxu0 }
 0xd59   :  { %v2669_v1 = vpop.f32.mrb[33].mxu0  ;;  %v2363_v3 = vadd.f32 %v2362_v0, %v2291_v2 }
 0xd5b   :  { %2366 = vst [vmem:[%s3118_s13] sm:$0xf] %v2363_v3 }

</bundles_post_ra>
